<compile_context>
chip_gen: v5e
topology: v5e:2x2
jax: 0.10.0
libtpu: 0.0.40
codegen_flags: <defaults>
</compile_context>

<pallas_src>
import functools

import jax
import jax.numpy as jnp
from jax.experimental import pallas as pl
from jax.experimental.pallas import tpu as pltpu

_LANE = 128
_SUBLANE = 8


def _round_up(v, m):
    return (v + m - 1) // m * m


# Generation-aware VMEM budget: ~80% of physical, never above 100 MiB.
try:
    _VMEM_CAP = int(pltpu.get_tpu_info().vmem_capacity_bytes)
except Exception:  # unknown hardware -> assume the smallest (v7x: 64 MiB / TC)
    _VMEM_CAP = 64 * 1024 * 1024
_VMEM_LIMIT = min(int(_VMEM_CAP * 0.8), 100 * 1024 * 1024)


def _const_spec(shape):
    """BlockSpec for a grid-invariant (weight/bias) block, single-buffered."""
    index_map = lambda i: (0,) * len(shape)
    try:
        return pl.BlockSpec(shape, index_map, pipeline_mode=pl.Buffered(1))
    except TypeError:  # older jax without pipeline_mode: fall back to default
        return pl.BlockSpec(shape, index_map)


def _fc_kernel(x_ref,
               w1s_ref, b1s_ref,
               w2_ref, b2_ref,
               w3_ref, b3_ref,
               o_ref, *, hp):
    """One batch tile of ReLU(ReLU(ReLU(xW1+b1)W2+b2)W3+b3) + (xWs+bs).

    w1s/b1s are [W1 | Ws] / [b1 | bs] concatenated along the output dim (2*hp).
    Matmuls run in the weights' dtype (bf16 by default) with f32 accumulation;
    bias adds and ReLUs stay in f32.
    """
    cdt = w1s_ref.dtype
    x = x_ref[...]          # already in compute dtype (cast in the wrapper)

    # Fused layer-1 + skip matmul over the shared LHS x.
    y = jnp.dot(x, w1s_ref[...],
                preferred_element_type=jnp.float32) + b1s_ref[...]
    h = jnp.maximum(y[:, :hp], 0.0)     # layer-1 activation (f32)
    skip = y[:, hp:].astype(cdt)        # skip path: narrow dtype, short live range

    h = jnp.dot(h.astype(cdt), w2_ref[...],
                preferred_element_type=jnp.float32) + b2_ref[...]
    h = jnp.maximum(h, 0.0)

    h = jnp.dot(h.astype(cdt), w3_ref[...],
                preferred_element_type=jnp.float32) + b3_ref[...]
    h = jnp.maximum(h, 0.0)

    o_ref[...] = (h + skip.astype(jnp.float32)).astype(o_ref.dtype)


@functools.partial(jax.jit,
                   static_argnames=("block_m", "compute_dtype", "out_dtype"))
def fc_forward(x, params, *, block_m=512, compute_dtype=jnp.bfloat16,
               out_dtype=None):
    """x: (N, H).  params: transposed weights (H, H) = (in, out), biases (1, H)."""
    n, h = x.shape
    odt = x.dtype if out_dtype is None else out_dtype
    hp = _round_up(max(h, _LANE), _LANE)        # lane-aligned hidden dim
    n8 = _round_up(max(n, _SUBLANE), _SUBLANE)  # sublane-aligned batch

    # Batch tile: large (512, or 1024 when weights are small) to amortize
    # per-step overhead, but capped so the grid has >= 2 steps when the batch
    # allows it (lets the "parallel" axis shard across v7x's two TensorCores).
    bm_cap = block_m if hp > 512 else max(block_m, 1024)
    bm = min(bm_cap, n8)
    if n8 >= 2 * _SUBLANE:
        bm = min(bm, _round_up((n8 + 1) // 2, _SUBLANE))
    n_pad = _round_up(n8, bm)

    f32 = jnp.float32

    def pad_w(w):
        return jnp.pad(w, ((0, hp - h), (0, hp - h))).astype(compute_dtype)

    def pad_b(b):
        return jnp.pad(b, ((0, 0), (0, hp - h))).astype(f32)

    w1, w2, w3, ws = (pad_w(params[k]) for k in ("w1", "w2", "w3", "ws"))
    b1, b2, b3, bs = (pad_b(params[k]) for k in ("b1", "b2", "b3", "bs"))

    # Fuse layer-1 and skip weights: one (hp, 2*hp) matmul for the shared LHS x.
    w1s = jnp.concatenate([w1, ws], axis=1)
    b1s = jnp.concatenate([b1, bs], axis=1)

    # Pad + cast x in the wrapper (pad already materializes a copy, so the cast
    # is free) -> halves the x HBM->VMEM DMA when compute dtype is bf16.
    xp = jnp.pad(x, ((0, n_pad - n), (0, hp - h))).astype(compute_dtype)

    x_spec = pl.BlockSpec((bm, hp), lambda i: (i, 0))
    o_spec = pl.BlockSpec((bm, hp), lambda i: (i, 0))

    cdt_bytes = jnp.dtype(compute_dtype).itemsize
    cost = pl.CostEstimate(
        flops=8 * n_pad * hp * hp,                       # 4 matmuls, 2*M*K*N each
        transcendentals=0,
        bytes_accessed=(n_pad * hp * cdt_bytes           # x
                        + 4 * hp * hp * cdt_bytes        # W1|Ws, W2, W3
                        + 4 * hp * 4                     # biases (f32)
                        + n_pad * hp * jnp.dtype(odt).itemsize))  # out

    out = pl.pallas_call(
        functools.partial(_fc_kernel, hp=hp),
        out_shape=jax.ShapeDtypeStruct((n_pad, hp), odt),
        grid=(n_pad // bm,),
        in_specs=[x_spec,
                  _const_spec((hp, 2 * hp)), _const_spec((1, 2 * hp)),
                  _const_spec((hp, hp)), _const_spec((1, hp)),
                  _const_spec((hp, hp)), _const_spec((1, hp))],
        out_specs=o_spec,
        compiler_params=pltpu.CompilerParams(
            dimension_semantics=("parallel",),
            vmem_limit_bytes=_VMEM_LIMIT),
        cost_estimate=cost,
    )(xp, w1s, b1s, w2, b2, w3, b3)

    return out[:n, :h]


def init_fc_params(key, hidden_dim, dtype=jnp.float32):
    """PyTorch-style init U(-1/sqrt(fan_in), 1/sqrt(fan_in)).

    Weights stored transposed (in, out); biases as (1, H)."""
    bound = 1.0 / (hidden_dim ** 0.5)
    keys = jax.random.split(key, 8)

    def u(k, shape):
        return jax.random.uniform(k, shape, dtype, minval=-bound, maxval=bound)

    return {
        "w1": u(keys[0], (hidden_dim, hidden_dim)), "b1": u(keys[1], (1, hidden_dim)),
        "w2": u(keys[2], (hidden_dim, hidden_dim)), "b2": u(keys[3], (1, hidden_dim)),
        "w3": u(keys[4], (hidden_dim, hidden_dim)), "b3": u(keys[5], (1, hidden_dim)),
        "ws": u(keys[6], (hidden_dim, hidden_dim)), "bs": u(keys[7], (1, hidden_dim)),
    }


def fc_reference(x, p, compute_dtype=None):
    """Pure-JAX reference.  If compute_dtype is given, mimic the kernel's
    operand rounding (weights/x cast to that dtype, f32 accumulation)."""
    if compute_dtype is None:
        cast = lambda a: a
    else:
        cast = lambda a: a.astype(compute_dtype).astype(jnp.float32)
    dot = lambda a, b: jnp.dot(cast(a), cast(b), preferred_element_type=jnp.float32)
    h = jax.nn.relu(dot(x, p["w1"]) + p["b1"])
    h = jax.nn.relu(dot(h, p["w2"]) + p["b2"])
    h = jax.nn.relu(dot(h, p["w3"]) + p["b3"])
    return h + (dot(x, p["ws"]) + p["bs"])


if __name__ == "__main__":
    hidden_dim = 32
    batch = 16

    key = jax.random.PRNGKey(0)
    k_x, k_p = jax.random.split(key)

    x = jax.random.normal(k_x, (batch, hidden_dim), jnp.float32)
    params = init_fc_params(k_p, hidden_dim)

    # bf16-compute path (default, the performant configuration).
    out_bf16 = fc_forward(x, params)
    jax.block_until_ready(out_bf16)
    ref_bf16 = fc_reference(x, params, compute_dtype=jnp.bfloat16)
    assert out_bf16.shape == (batch, hidden_dim)
    assert jnp.allclose(out_bf16, ref_bf16, atol=2e-2, rtol=2e-2), "bf16 mismatch"

    # f32-compute path for a tight numerical check of the kernel structure.
    out_f32 = fc_forward(x, params, compute_dtype=jnp.float32)
    jax.block_until_ready(out_f32)
    ref_f32 = fc_reference(x, params)
    assert jnp.allclose(out_f32, ref_f32, atol=1e-4, rtol=1e-4), "f32 mismatch"

    print("KERNEL_OK")
</pallas_src>

<mosaic_0001>
module attributes {stable_mosaic.version = 11 : i64} {
  func.func @_fc_kernel(%arg0: i32, %arg1: memref<8x128xbf16, #tpu.memory_space<vmem>>, %arg2: memref<128x256xbf16, #tpu.memory_space<vmem>>, %arg3: memref<1x256xf32, #tpu.memory_space<vmem>>, %arg4: memref<128x128xbf16, #tpu.memory_space<vmem>>, %arg5: memref<1x128xf32, #tpu.memory_space<vmem>>, %arg6: memref<128x128xbf16, #tpu.memory_space<vmem>>, %arg7: memref<1x128xf32, #tpu.memory_space<vmem>>, %arg8: memref<8x128xf32, #tpu.memory_space<vmem>>) attributes {dimension_semantics = [#tpu.dimension_semantics<parallel>], iteration_bounds = array<i64: 2>, scalar_prefetch = 0 : i64, scratch_operands = 0 : i64, tpu.core_type = #tpu.core_type<tc>, window_params = [{transform_indices = @transform_0, window_bounds = array<i64: 8, 128>}, {pipeline_mode = #tpu.pipeline_mode<synchronous>, transform_indices = @transform_1, window_bounds = array<i64: 128, 256>}, {pipeline_mode = #tpu.pipeline_mode<synchronous>, transform_indices = @transform_2, window_bounds = array<i64: 1, 256>}, {pipeline_mode = #tpu.pipeline_mode<synchronous>, transform_indices = @transform_3, window_bounds = array<i64: 128, 128>}, {pipeline_mode = #tpu.pipeline_mode<synchronous>, transform_indices = @transform_4, window_bounds = array<i64: 1, 128>}, {pipeline_mode = #tpu.pipeline_mode<synchronous>, transform_indices = @transform_5, window_bounds = array<i64: 128, 128>}, {pipeline_mode = #tpu.pipeline_mode<synchronous>, transform_indices = @transform_6, window_bounds = array<i64: 1, 128>}, {transform_indices = @transform_7, window_bounds = array<i64: 8, 128>}]} {
    %c0 = arith.constant 0 : index
    %c0_0 = arith.constant 0 : index
    %0 = vector.load %arg1[%c0, %c0_0] : memref<8x128xbf16, #tpu.memory_space<vmem>>, vector<8x128xbf16>
    %c0_1 = arith.constant 0 : index
    %c0_2 = arith.constant 0 : index
    %1 = vector.load %arg2[%c0_1, %c0_2] : memref<128x256xbf16, #tpu.memory_space<vmem>>, vector<128x256xbf16>
    %cst = arith.constant dense<0.000000e+00> : vector<8x256xf32>
    %2 = tpu.matmul %0, %1, %cst {dimension_numbers = #tpu.dot_dimension_numbers<[1], [0], [0], [1], [0, 0, 1, 1], [], []>} : vector<8x128xbf16>, vector<128x256xbf16>, vector<8x256xf32> -> vector<8x256xf32>
    %c0_3 = arith.constant 0 : index
    %c0_4 = arith.constant 0 : index
    %3 = vector.load %arg3[%c0_3, %c0_4] : memref<1x256xf32, #tpu.memory_space<vmem>>, vector<1x256xf32>
    %4 = vector.broadcast %3 : vector<1x256xf32> to vector<8x256xf32>
    %5 = arith.addf %2, %4 : vector<8x256xf32>
    %6 = vector.extract_strided_slice %5 {offsets = [0, 0], sizes = [8, 128], strides = [1, 1]} : vector<8x256xf32> to vector<8x128xf32>
    %cst_5 = arith.constant 0.000000e+00 : f32
    %7 = vector.broadcast %cst_5 : f32 to vector<8x128xf32>
    %8 = arith.maximumf %6, %7 : vector<8x128xf32>
    %9 = vector.extract_strided_slice %5 {offsets = [0, 128], sizes = [8, 128], strides = [1, 1]} : vector<8x256xf32> to vector<8x128xf32>
    %10 = arith.truncf %9 : vector<8x128xf32> to vector<8x128xbf16>
    %11 = arith.truncf %8 : vector<8x128xf32> to vector<8x128xbf16>
    %c0_6 = arith.constant 0 : index
    %c0_7 = arith.constant 0 : index
    %12 = vector.load %arg4[%c0_6, %c0_7] : memref<128x128xbf16, #tpu.memory_space<vmem>>, vector<128x128xbf16>
    %cst_8 = arith.constant dense<0.000000e+00> : vector<8x128xf32>
    %13 = tpu.matmul %11, %12, %cst_8 {dimension_numbers = #tpu.dot_dimension_numbers<[1], [0], [0], [1], [0, 0, 1, 1], [], []>} : vector<8x128xbf16>, vector<128x128xbf16>, vector<8x128xf32> -> vector<8x128xf32>
    %c0_9 = arith.constant 0 : index
    %c0_10 = arith.constant 0 : index
    %14 = vector.load %arg5[%c0_9, %c0_10] : memref<1x128xf32, #tpu.memory_space<vmem>>, vector<1x128xf32>
    %15 = vector.broadcast %14 : vector<1x128xf32> to vector<8x128xf32>
    %16 = arith.addf %13, %15 : vector<8x128xf32>
    %cst_11 = arith.constant 0.000000e+00 : f32
    %17 = vector.broadcast %cst_11 : f32 to vector<8x128xf32>
    %18 = arith.maximumf %16, %17 : vector<8x128xf32>
    %19 = arith.truncf %18 : vector<8x128xf32> to vector<8x128xbf16>
    %c0_12 = arith.constant 0 : index
    %c0_13 = arith.constant 0 : index
    %20 = vector.load %arg6[%c0_12, %c0_13] : memref<128x128xbf16, #tpu.memory_space<vmem>>, vector<128x128xbf16>
    %cst_14 = arith.constant dense<0.000000e+00> : vector<8x128xf32>
    %21 = tpu.matmul %19, %20, %cst_14 {dimension_numbers = #tpu.dot_dimension_numbers<[1], [0], [0], [1], [0, 0, 1, 1], [], []>} : vector<8x128xbf16>, vector<128x128xbf16>, vector<8x128xf32> -> vector<8x128xf32>
    %c0_15 = arith.constant 0 : index
    %c0_16 = arith.constant 0 : index
    %22 = vector.load %arg7[%c0_15, %c0_16] : memref<1x128xf32, #tpu.memory_space<vmem>>, vector<1x128xf32>
    %23 = vector.broadcast %22 : vector<1x128xf32> to vector<8x128xf32>
    %24 = arith.addf %21, %23 : vector<8x128xf32>
    %cst_17 = arith.constant 0.000000e+00 : f32
    %25 = vector.broadcast %cst_17 : f32 to vector<8x128xf32>
    %26 = arith.maximumf %24, %25 : vector<8x128xf32>
    %27 = arith.extf %10 : vector<8x128xbf16> to vector<8x128xf32>
    %28 = arith.addf %26, %27 : vector<8x128xf32>
    %c0_18 = arith.constant 0 : index
    %c0_19 = arith.constant 0 : index
    %29 = vector.load %arg8[%c0_18, %c0_19] : memref<8x128xf32, #tpu.memory_space<vmem>>, vector<8x128xf32>
    tpu.vector_store %arg8[%c0_18, %c0_19], %28 {strides = array<i32>} : memref<8x128xf32, #tpu.memory_space<vmem>>, vector<8x128xf32>,
    return
  }
  func.func @transform_0(%arg0: i32) -> (i32, i32) {
    %c0_i32 = arith.constant 0 : i32
    %c0_i32_0 = arith.constant 0 : i32
    return %arg0, %c0_i32 : i32, i32
  }
  func.func @transform_1(%arg0: i32) -> (i32, i32) {
    %c0_i32 = arith.constant 0 : i32
    %c0_i32_0 = arith.constant 0 : i32
    %c0_i32_1 = arith.constant 0 : i32
    return %c0_i32, %c0_i32_0 : i32, i32
  }
  func.func @transform_2(%arg0: i32) -> (i32, i32) {
    %c0_i32 = arith.constant 0 : i32
    %c0_i32_0 = arith.constant 0 : i32
    %c0_i32_1 = arith.constant 0 : i32
    return %c0_i32, %c0_i32_0 : i32, i32
  }
  func.func @transform_3(%arg0: i32) -> (i32, i32) {
    %c0_i32 = arith.constant 0 : i32
    %c0_i32_0 = arith.constant 0 : i32
    %c0_i32_1 = arith.constant 0 : i32
    return %c0_i32, %c0_i32_0 : i32, i32
  }
  func.func @transform_4(%arg0: i32) -> (i32, i32) {
    %c0_i32 = arith.constant 0 : i32
    %c0_i32_0 = arith.constant 0 : i32
    %c0_i32_1 = arith.constant 0 : i32
    return %c0_i32, %c0_i32_0 : i32, i32
  }
  func.func @transform_5(%arg0: i32) -> (i32, i32) {
    %c0_i32 = arith.constant 0 : i32
    %c0_i32_0 = arith.constant 0 : i32
    %c0_i32_1 = arith.constant 0 : i32
    return %c0_i32, %c0_i32_0 : i32, i32
  }
  func.func @transform_6(%arg0: i32) -> (i32, i32) {
    %c0_i32 = arith.constant 0 : i32
    %c0_i32_0 = arith.constant 0 : i32
    %c0_i32_1 = arith.constant 0 : i32
    return %c0_i32, %c0_i32_0 : i32, i32
  }
  func.func @transform_7(%arg0: i32) -> (i32, i32) {
    %c0_i32 = arith.constant 0 : i32
    %c0_i32_0 = arith.constant 0 : i32
    return %arg0, %c0_i32 : i32, i32
  }
}

</mosaic_0001>

<bundles_post_ra>
// kernel: fc_forward.1
= control target key start
LH: loop header
LB: loop body
LE: loop exit
PB: predicated region body
PF: predicated region fallthrough
CT: control target
= control target key end

     0   :  { %12 = vsyncpa [#allocation3], 0  ;;  %s1202_s0 = inlined_call_operand.vmem [shape: bf16[16,128], index: 0, kind: input, shape index: {}]   ;;  %s1203_s1 = inlined_call_operand.vmem [shape: bf16[128,256], index: 1, kind: input, shape index: {}]   ;;  %s1204_s2 = inlined_call_operand.vmem [shape: f32[1,256], index: 2, kind: input, shape index: {}]   ;;  %s1205_s3 = inlined_call_operand.vmem [shape: bf16[128,128], index: 3, kind: input, shape index: {}]   ;;  %s1206_s4 = inlined_call_operand.vmem [shape: f32[1,128], index: 4, kind: input, shape index: {}]   ;;  %s1207_s5 = inlined_call_operand.vmem [shape: bf16[128,128], index: 5, kind: input, shape index: {}]   ;;  %s1208_s6 = inlined_call_operand.vmem [shape: f32[1,128], index: 6, kind: input, shape index: {}]   ;;  %s1209_s7 = inlined_call_operand.hbm [shape: f32[16,128], index: 7, kind: output, shape index: {}]  }
   0x1   :  { %14 = vsyncpa [#allocation3 + $0x1], 0  ;;  %s964_s24 = smov 0   ;;  %s966_s25 = smov 0  }
   0x2   :  { %s968_s26 = smov 0   ;;  %s970_s27 = smov 0  }
   0x3 LB: > { %s985_s28 = sadd.s32 4294967295, %s922_s27   ;;  %s649_s29 = sadd.s32 4294967294, %s922_s27   ;;  %s922_s27 = sphi %s970_s27, %s1215_s27   ;;  %s918_s26 = sphi %s968_s26, %s1214_s26   ;;  %s914_s25 = sphi %s966_s25, %s1213_s25   ;;  %s910_s24 = sphi %s964_s24, %s1212_s24  }
   0x4   : > { %s989_s30 = sadd.s32 1, %s922_s27   ;;  %s179_s8 = sadd.s32 1, %s918_s26 }
   0x5   : > { %s176_s9 = ssub.s32 %s922_s27, %s989_s30  ;;  %p189_p0 = scmp.ne.s32.totalorder %s918_s26, %s914_s25 }
   0x6   : > { %p177_p1 = scmp.eq.s32.totalorder %s176_s9, 0  ;;  %p190_p2 = scmp.eq.s32.totalorder %s985_s28, 1 }
   0x7   : > { %p195_p3 = scmp.ne.s32.totalorder %s914_s25, %s910_s24  ;;  %p196_p4 = scmp.eq.s32.totalorder %s649_s29, 1 }
   0x8   : > { %s1000_s10 = scalar_select %p177_p1, %s918_s26, %s179_s8  }
   0x9   : > { %p1002_p5 = por %p190_p2, %p189_p0  ;;  %p1006_p6 = por %p196_p4, %p195_p3 }
   0xa   : > { %p652_p7 = scmp.ge.s32.totalorder %s922_s27, 1  ;;  %p239_p8 = scmp.lt.s32.totalorder %s922_s27, 3 }
   0xc   : > { %p240_p9 = pnand %p652_p7, %p239_p8 }
   0xd   : > { %p270_p10 = scmp.lt.s32.totalorder (!%p240_p9), %s985_s28, 1  ;;  %s267_s20 = sand.u32 (!%p240_p9), 1, %s914_s25  }
   0xe   : > { %243 = sbr.rel (%p240_p9) target bundleno = 465 (0x1d1), region = 48  ;;  %s653_s21 = sshll.u32 (!%p240_p9), %s267_s20, 3 }
   0xf   : > { %s784_s22 = sshll.u32 (!%p240_p9), %s985_s28, 3  ;;  %s269_s14 = scalar_lea.vmem (!%p240_p9), [#allocation2], %s653_s21 }
  0x10   : > { %s585_s13 = scalar_lea.hbm (!%p240_p9), %s1209_s7, %s784_s22  ;;  %s587_s15 = sshll.u32 (!%p240_p9), %s269_s14, 4  ;;  %s588_s15 = int_to_ptr.vmem [resolvable:$true] %s587_s15 }
  0x11   : > { %s880_s21 = scalar_lea.hbm (!%p240_p9), %s1209_s7, 16 }
  0x13   : > { %v713_v0 = vld [vmem:[%s1203_s1 + $0x70] sm:$0xf]  ;;  %v802_v1 = vld [vmem:[%s1203_s1 + $0x74] sm:$0xf0]  ;;  %v705_v2 = vld [vmem:[%s1203_s1 + $0x60] sm:$0xf] }
  0x14   : > { %v714_v3 = vor.u32 %v802_v1, %v713_v0  ;;  %v800_v4 = vld [vmem:[%s1203_s1 + $0x64] sm:$0xf0]  ;;  %v697_v6 = vld [vmem:[%s1203_s1 + $0x50] sm:$0xf]  ;;  %v798_v7 = vld [vmem:[%s1203_s1 + $0x54] sm:$0xf0] }
  0x15   : > { %v706_v5 = vor.u32 %v800_v4, %v705_v2  ;;  %v810_v8 = vld [vmem:[%s1205_s3 + $0x38] sm:$0xff]  ;;  %v698_v9 = vor.u32 %v798_v7, %v697_v6  ;;  %v809_v10 = vld [vmem:[%s1205_s3 + $0x30] sm:$0xff]  ;;  %v689_v11 = vld [vmem:[%s1203_s1 + $0x40] sm:$0xf]  ;;  %s271_s23 = scalar_select %p270_p10, %s985_s28, 1 }
  0x16   : > { %377 = vmatpush.bf16.msra.mxu0 %v714_v3  ;;  %474 = vmatpush.bf16.msra.mxu2 %v810_v8  ;;  %v796_v12 = vld [vmem:[%s1203_s1 + $0x44] sm:$0xf0]  ;;  %v681_v15 = vld [vmem:[%s1203_s1 + $0x30] sm:$0xf]  ;;  %v794_v16 = vld [vmem:[%s1203_s1 + $0x34] sm:$0xf0] }
  0x17   : > { %v690_v13 = vor.u32 %v796_v12, %v689_v11  ;;  %v808_v14 = vld [vmem:[%s1205_s3 + $0x28] sm:$0xff]  ;;  %v682_v17 = vor.u32 %v794_v16, %v681_v15  ;;  %v807_v18 = vld [vmem:[%s1205_s3 + $0x20] sm:$0xff]  ;;  %v806_v22 = vld [vmem:[%s1205_s3 + $0x18] sm:$0xff]  ;;  %s654_s16 = sshll.u32 %s271_s23, 2  ;;  %s575_s28 = scalar_lea.sflag [#allocation3], %s267_s20 }
  0x18   : > { %v673_v19 = vld [vmem:[%s1203_s1 + $0x20] sm:$0xf]  ;;  %v792_v20 = vld [vmem:[%s1203_s1 + $0x24] sm:$0xf0]  ;;  %v665_v23 = vld [vmem:[%s1203_s1 + $0x10] sm:$0xf]  ;;  %s273_s19 = scalar_lea.vmem %s1202_s0, %s654_s16 }
  0x19   : > { %v674_v21 = vor.u32 %v792_v20, %v673_v19  ;;  %v790_v24 = vld [vmem:[%s1203_s1 + $0x14] sm:$0xf0]  ;;  %v805_v26 = vld [vmem:[%s1205_s3 + $0x10] sm:$0xff]  ;;  %v657_v27 = vld [vmem:[%s1203_s1] sm:$0xf]  ;;  %s589_s16 = sshll.u32 %s585_s13, 4  ;;  %s590_s16 = int_to_ptr.hbm [resolvable:$true] %s589_s16 }
  0x1a   : > { %378 = vmatpush.bf16.msra.mxu0 %v706_v5  ;;  %475 = vmatpush.bf16.msra.mxu2 %v809_v10  ;;  %v666_v25 = vor.u32 %v790_v24, %v665_v23  ;;  %v788_v28 = vld [vmem:[%s1203_s1 + $0x4] sm:$0xf0]  ;;  %v274_v30 = vld [vmem:[%s273_s19] sm:$0xf]  ;;  %v801_v33 = vld [vmem:[%s1203_s1 + $0x74] sm:$0xf] }
  0x1b   : > { %v658_v29 = vor.u32 %v788_v28, %v657_v27  ;;  %v804_v31 = vld [vmem:[%s1205_s3 + $0x8] sm:$0xff]  ;;  %v803_v32 = vld [vmem:[%s1205_s3] sm:$0xff]  ;;  %v715_v34 = vld [vmem:[%s1203_s1 + $0x78] sm:$0xf0]  ;;  %s874_s17 = sshra.s32 %s590_s16, 4  ;;  %s875_s17 = int_to_ptr.hbm [resolvable:$true] %s874_s17 }
  0x1c   : > { %v799_v35 = vld [vmem:[%s1203_s1 + $0x64] sm:$0xf]  ;;  %v718_v36 = vor.u32 %v801_v33, %v715_v34  ;;  %v707_v37 = vld [vmem:[%s1203_s1 + $0x68] sm:$0xf0]  ;;  %v818_v38 = vld [vmem:[%s1207_s5 + $0x38] sm:$0xff]  ;;  %s876_s18 = scalar_lea.hbm %s875_s17, 8  ;;  %p881_p0 = scmp.lt.s32.totalorder %s875_s17, %s1209_s7 }
  0x1d   : > { %v710_v39 = vor.u32 %v799_v35, %v707_v37  ;;  %557 = vmatpush.bf16.msra.mxu3 %v818_v38  ;;  %v817_v40 = vld [vmem:[%s1207_s5 + $0x30] sm:$0xff]  ;;  %v699_v42 = vld [vmem:[%s1203_s1 + $0x58] sm:$0xf0]  ;;  %v816_v44 = vld [vmem:[%s1207_s5 + $0x28] sm:$0xff]  ;;  %p877_p11 = scmp.ne.s32.totalorder %s875_s17, %s876_s18  ;;  %p882_p1 = scmp.lt.s32.totalorder %s880_s21, %s876_s18 }
  0x1e   : > { %379 = vmatpush.bf16.msra.mxu0 %v698_v9  ;;  %476 = vmatpush.bf16.msra.mxu2 %v808_v14  ;;  %v797_v41 = vld [vmem:[%s1203_s1 + $0x54] sm:$0xf]  ;;  %v795_v45 = vld [vmem:[%s1203_s1 + $0x44] sm:$0xf]  ;;  %v691_v46 = vld [vmem:[%s1203_s1 + $0x48] sm:$0xf0] }
  0x1f   : > { %390 = vmatpush.bf16.msra.mxu1 %v718_v36  ;;  %v702_v43 = vor.u32 %v797_v41, %v699_v42  ;;  %v694_v47 = vor.u32 %v795_v45, %v691_v46  ;;  %v815_v48 = vld [vmem:[%s1207_s5 + $0x20] sm:$0xff]  ;;  %v793_v49 = vld [vmem:[%s1203_s1 + $0x34] sm:$0xf]  ;;  %v683_v50 = vld [vmem:[%s1203_s1 + $0x38] sm:$0xf0]  ;;  %p878_p12 = pnand %p877_p11, %p1002_p5  ;;  %p883_p2 = por %p882_p1, %p881_p0 }
  0x20   : > { %v686_v51 = vor.u32 %v793_v49, %v683_v50  ;;  %v814_v52 = vld [vmem:[%s1207_s5 + $0x18] sm:$0xff]  ;;  %v791_v53 = vld [vmem:[%s1203_s1 + $0x24] sm:$0xf]  ;;  %v675_v54 = vld [vmem:[%s1203_s1 + $0x28] sm:$0xf0] }
  0x21   : > { %558 = vmatpush.bf16.msra.mxu3 %v817_v40  ;;  %v291_v55 = vld [vmem:[%s1204_s2] sm:$0x3]  ;;  %v678_v56 = vor.u32 %v791_v53, %v675_v54  ;;  %v813_v57 = vld [vmem:[%s1207_s5 + $0x10] sm:$0xff]  ;;  %v667_v59 = vld [vmem:[%s1203_s1 + $0x18] sm:$0xf0]  ;;  %p879_p13 = pneg %p878_p12 }
  0x22   : > { %380 = vmatpush.bf16.msra.mxu0 %v690_v13  ;;  %477 = vmatpush.bf16.msra.mxu2 %v807_v18  ;;  %v789_v58 = vld [vmem:[%s1203_s1 + $0x14] sm:$0xf]  ;;  %v293_v60 = vperm.slane %v291_v55, 0  ;;  %v787_v63 = vld [vmem:[%s1203_s1 + $0x4] sm:$0xf]  ;;  %v812_v6 = vld [vmem:[%s1207_s5 + $0x8] sm:$0xff] }
  0x23   : > { %391 = vmatpush.bf16.msra.mxu1 %v710_v39  ;;  %v670_v61 = vor.u32 %v789_v58, %v667_v59  ;;  %v659_v0 = vld [vmem:[%s1203_s1 + $0x8] sm:$0xf0]  ;;  %v811_v7 = vld [vmem:[%s1207_s5] sm:$0xff]  ;;  %v294_v16 = vperm.slane %v291_v55, 1  ;;  %p884_p3 = pnand %p883_p2, %p879_p13 }
  0x24   : > { %v662_v3 = vor.u32 %v787_v63, %v659_v0  ;;  %v858_v8 = vld [vmem:[%s1206_s4] ss:$0 sm:$0xff] }
  0x25   : > { %559 = vmatpush.bf16.msra.mxu3 %v816_v44  ;;  %v859_v19 = vld [vmem:[%s1208_s6] ss:$0 sm:$0xff] }
  0x26   : > { %381 = vmatpush.bf16.msra.mxu0 %v682_v17  ;;  %478 = vmatpush.bf16.msra.mxu2 %v806_v22 }
  0x27   : > { %392 = vmatpush.bf16.msra.mxu1 %v702_v43 }
  0x29   : > { %560 = vmatpush.bf16.msra.mxu3 %v815_v48 }
  0x2a   : > { %382 = vmatpush.bf16.msra.mxu0 %v674_v21  ;;  %479 = vmatpush.bf16.msra.mxu2 %v805_v26 }
  0x2b   : > { %393 = vmatpush.bf16.msra.mxu1 %v694_v47 }
  0x2d   : > { %561 = vmatpush.bf16.msra.mxu3 %v814_v52 }
  0x2e   : > { %383 = vmatpush.bf16.msra.mxu0 %v666_v25  ;;  %480 = vmatpush.bf16.msra.mxu2 %v804_v31 }
  0x2f   : > { %394 = vmatpush.bf16.msra.mxu1 %v686_v51 }
  0x31   : > { %562 = vmatpush.bf16.msra.mxu3 %v813_v57 }
  0x32   : > { %384 = vmatpush.bf16.msra.mxu0 %v658_v29  ;;  %481 = vmatpush.bf16.msra.mxu2 %v803_v32 }
  0x33   : > { %395 = vmatpush.bf16.msra.mxu1 %v678_v56 }
  0x35   : > { %385 = vmatmul.bf16.vlgmr.msra.gmra.mxu0 %v274_v30  ;;  %563 = vmatpush.bf16.msra.mxu3 %v812_v6 }
  0x37   : > { %396 = vmatpush.bf16.msra.mxu1 %v670_v61 }
  0x39   : > { %564 = vmatpush.bf16.msra.mxu3 %v811_v7 }
  0x3b   : > { %397 = vmatpush.bf16.msra.mxu1 %v662_v3 }
  0x3e   : > { %398 = vmatmul.bf16.vlgmr.msra.gmra.mxu1 %v274_v30 }
  0xb2   : > { %v386_v62 = vpop.f32.mrf.mxu0 }
  0xb3   : > { %v387_v1 = vadd.f32 %v386_v62, %v293_v60 }
  0xb5   : > { %v403_v2 = vmax.f32 %v387_v1, 0.0 }
  0xb7   : > { %v405_v4 = vpack.c.bf16 %v403_v2, %v403_v2 }
  0xb9   : > { %482 = vmatmul.bf16.vlgmr.msra.gmra.mxu2 %v405_v4 }
  0xba   : > { %v388_v5 = vpop.f32.mrf.mxu0 }
  0xbb   : > { %v399_v9 = vpop.f32.mrf.mxu1 }
  0xbc   : > { %v400_v17 = vadd.f32 %v399_v9, %v294_v16 }
  0xbe   : > { %v404_v18 = vpack.c.bf16 %v400_v17, %v400_v17 }
  0xc0   : > { %v571_v21 = vunpack.c.l.bf16 %v404_v18 }
  0xc3   : > { %v401_v14 = vpop.f32.mrf.mxu1 }
 0x13c   : > { %v483_v10 = vpop.f32.mrf.mxu2 }
 0x13d   : > { %v484_v11 = vadd.f32 %v858_v8, %v483_v10 }
 0x13f   : > { %v487_v12 = vmax.f32 %v484_v11, 0.0 }
 0x141   : > { %v488_v13 = vpack.c.bf16 %v487_v12, %v487_v12 }
 0x143   : > { %565 = vmatmul.bf16.vlgmr.msra.gmra.mxu3 %v488_v13 }
 0x144   : > { %v485_v15 = vpop.f32.mrf.mxu2 }
 0x1c6   : > { %v566_v20 = vpop.f32.mrf.mxu3 }
 0x1c7   : > { %v567_v22 = vadd.f32 %v859_v19, %v566_v20 }
 0x1c9   : > { %v570_v23 = vmax.f32 %v567_v22, 0.0 }
 0x1cb   : > { %v572_v24 = vadd.f32 %v571_v21, %v570_v23 }
 0x1cd   : > { %573 = vst [vmem:[%s269_s14] sm:$0xff] %v572_v24 }
 0x1ce   : > { %v568_v25 = vpop.f32.mrf.mxu3 }
 0x1cf   : > { %887 = shalt.err (!%p884_p3)
}
 0x1d0   : > { %819 = dma.vmem_to_hbm [thread:$0]  (%p1002_p5), %s588_s15, 128, %s590_s16, %s575_s28  }
 0x1d1 PF: > { %p825_p4 = scmp.ge.s32.totalorder %s922_s27, 2  ;;  %s601_s20 = sand.u32 1, %s910_s24  }
 0x1d2   : > { %s602_s8 = scalar_lea.sflag [#allocation3], %s601_s20 }
 0x1d3   : > { %p822_p7 = pnand %p825_p4, %p1006_p6 }
 0x1d5   : > { %p823_p8 = pneg %p822_p7 }
 0x1d7   : > { %905 = dma.done.wait (%p823_p8), %s602_s8, 128  }
 0x1d8   : > { %907 = vsyncadd (%p823_p8), %s602_s8, 4294967168  ;;  %p17_p9 = scmp.ge.s32.totalorder %s989_s30, 4   ;;  %s1212_s24 = smov %s914_s25 }
 0x1d9   : > { %s1213_s25 = smov %s918_s26  ;;  %s1214_s26 = smov %s1000_s10 }
 0x1da   : > { %s1215_s27 = smov %s989_s30  ;;  %19 = sbr.rel (!%p17_p9) target bundleno = 3 (0x3), region = 83 }
 0x1df   :  { %608 = vsyncpa [#allocation3], 1 }
 0x1e0   :  { %610 = vsyncpa [#allocation3 + $0x1], 1 }

</bundles_post_ra>
